<compile_context>
chip_gen: v5e
topology: v5e:2x2
jax: 0.10.0
libtpu: 0.0.40
codegen_flags: <defaults>
</compile_context>

<pallas_src>
import functools

import jax
import jax.numpy as jnp
from jax.experimental import pallas as pl
from jax.experimental.pallas import tpu as pltpu


def _round_up(n, m):
    return ((n + m - 1) // m) * m


def _vmem_capacity_bytes():
    try:
        cap = int(getattr(pltpu.get_tpu_info(), "vmem_capacity_bytes"))
        if cap > 0:
            return cap
    except Exception:
        pass
    return 64 * 1024 * 1024  # conservative fallback (v7x per-core VMEM)


def _pick_block_b(B, C, itemsize, vmem_cap):
    """Pick the batch tile: as big as VMEM allows, but keep >= 2 grid steps."""
    budget = vmem_cap // 3  # headroom for double-buffering + f32 temporaries
    # 2x double-buffered input tile (native dtype) + ~4 f32-sized temporaries.
    per_row = 2 * C * itemsize + 4 * C * 4
    bt = budget // max(per_row, 1)
    bt = max(8, min(2048, (bt // 8) * 8))
    bt = min(bt, _round_up(B, 8))          # never bigger than the (padded) batch
    if B > 8:
        # Keep at least two grid steps so "parallel" can use both TCs on v7x
        # (costs one ~0.35us extra step on 1-TC chips -> negligible).
        bt = min(bt, max(8, _round_up(-(-B // 2), 8)))
    return bt


def _focal_loss_kernel(*refs, gamma, batch, block_b, has_weight):
    if has_weight:
        x_ref, t_ref, wt_ref, out_ref = refs
    else:
        x_ref, t_ref, out_ref = refs
        wt_ref = None

    x = x_ref[...].astype(jnp.float32)          # (bt, C) logits tile (cast in VMEM)
    t = t_ref[...]                              # (bt, 1) int32 targets

    # Numerically stable cross entropy: ce = logsumexp(x) - x[target]
    m = jnp.max(x, axis=-1, keepdims=True)                              # (bt, 1)
    z = x - m                                                           # (bt, C)
    lse = jnp.log(jnp.sum(jnp.exp(z), axis=-1, keepdims=True))          # (bt, 1)

    classes = jax.lax.broadcasted_iota(jnp.int32, z.shape, 1)           # (bt, C)
    onehot = t == classes
    picked = jnp.sum(jnp.where(onehot, z, 0.0), axis=-1, keepdims=True)  # x[t]-m

    ce = lse - picked                                                   # (bt, 1) >= 0

    if wt_ref is not None:
        # w[target] was gathered in the wrapper -> just a per-row scale here,
        # matching torch cross_entropy(weight=..., reduction='none').
        ce = wt_ref[...].astype(jnp.float32) * ce

    # Focal modulation (VALU-only for integer gamma; jnp.power = log+exp on EUP).
    if gamma == 0.0:
        loss = ce
    else:
        p = jnp.exp(-ce)
        one_minus_p = 1.0 - p
        if float(gamma).is_integer() and 1 <= int(gamma) <= 8:
            mod = one_minus_p
            for _ in range(int(gamma) - 1):
                mod = mod * one_minus_p
        else:
            mod = jnp.power(one_minus_p, gamma)
        loss = mod * ce

    # Mask rows past the real batch (ragged last tile handled in-kernel; no
    # wrapper-side padding copy). Skipped entirely when the tiling is exact.
    if batch % block_b != 0:
        row = pl.program_id(0) * block_b + jax.lax.broadcasted_iota(
            jnp.int32, loss.shape, 0
        )
        loss = jnp.where(row < batch, loss, 0.0)

    tile_sum = jnp.sum(loss)

    # Lane-dense (8, 128) output block; partial sum lives in element [0, 0],
    # zeros elsewhere, so the wrapper can just sum the whole output.
    r = jax.lax.broadcasted_iota(jnp.int32, (8, 128), 0)
    c = jax.lax.broadcasted_iota(jnp.int32, (8, 128), 1)
    out_ref[...] = jnp.where((r == 0) & (c == 0), tile_sum, 0.0)


def focal_loss(logits, target, *, gamma=0.0, weight=None, block_b=None):
    """logits: (B, C) float, target: (B,) int, weight: optional (C,) -> scalar f32."""
    B, C = logits.shape
    itemsize = jnp.dtype(logits.dtype).itemsize
    vmem_cap = _vmem_capacity_bytes()

    if block_b is not None:
        bt = min(max(8, _round_up(int(block_b), 8)), _round_up(B, 8))
    else:
        bt = _pick_block_b(B, C, itemsize, vmem_cap)
    num_tiles = (B + bt - 1) // bt

    t = jnp.asarray(target, jnp.int32).reshape(B, 1)

    has_weight = weight is not None
    in_specs = [
        pl.BlockSpec((bt, C), lambda i: (i, 0)),   # logits tile (native dtype)
        pl.BlockSpec((bt, 1), lambda i: (i, 0)),   # targets tile
    ]
    args = [logits, t]
    if has_weight:
        # Tiny (B,) gather in the wrapper instead of streaming a (1, C) block
        # and doing a second masked cross-lane reduce per tile.
        w_t = jnp.take(jnp.asarray(weight, jnp.float32),
                       jnp.asarray(target, jnp.int32), axis=0).reshape(B, 1)
        in_specs.append(pl.BlockSpec((bt, 1), lambda i: (i, 0)))
        args.append(w_t)

    kernel = functools.partial(
        _focal_loss_kernel,
        gamma=float(gamma),
        batch=B,
        block_b=bt,
        has_weight=has_weight,
    )

    cost = pl.CostEstimate(
        flops=8 * B * C,
        transcendentals=B * C + 2 * B,
        bytes_accessed=B * C * itemsize + B * 4 * (2 if has_weight else 1)
        + num_tiles * 8 * 128 * 4,
    )

    partials = pl.pallas_call(
        kernel,
        out_shape=jax.ShapeDtypeStruct((num_tiles * 8, 128), jnp.float32),
        grid=(num_tiles,),
        in_specs=in_specs,
        out_specs=pl.BlockSpec((8, 128), lambda i: (i, 0)),
        compiler_params=pltpu.CompilerParams(
            dimension_semantics=("parallel",),
            vmem_limit_bytes=int(vmem_cap * 3 // 4),
        ),
        cost_estimate=cost,
    )(*args)

    # reduction='none' focal losses summed per tile -> mean over the real batch.
    return jnp.sum(partials) / jnp.float32(B)


def focal_loss_ref(logits, target, *, gamma=0.0, weight=None):
    """Pure-JAX reference mirroring the PyTorch forward."""
    logp = jax.nn.log_softmax(jnp.asarray(logits, jnp.float32), axis=-1)
    ce = -jnp.take_along_axis(
        logp, jnp.asarray(target, jnp.int32)[:, None], axis=-1
    )[:, 0]
    if weight is not None:
        ce = jnp.asarray(weight, jnp.float32)[target] * ce
    p = jnp.exp(-ce)
    return jnp.mean((1.0 - p) ** gamma * ce)


if __name__ == "__main__":
    key = jax.random.PRNGKey(0)
    k1, k2, k3, k4, k5 = jax.random.split(key, 5)

    # Small module-consistent shapes: classification logits (batch, num_classes).
    batch, num_classes = 8, 16
    logits = jax.random.normal(k1, (batch, num_classes), dtype=jnp.float32) * 3.0
    target = jax.random.randint(k2, (batch,), 0, num_classes, dtype=jnp.int32)
    weight = jax.random.uniform(k3, (num_classes,), jnp.float32, minval=0.5, maxval=1.5)

    # default module config (gamma=0, no weight), focal gamma>0, weighted case
    for gamma, w in [(0.0, None), (2.0, None), (2.0, weight)]:
        out = focal_loss(logits, target, gamma=gamma, weight=w)
        jax.block_until_ready(out)
        ref = focal_loss_ref(logits, target, gamma=gamma, weight=w)
        assert jnp.allclose(out, ref, rtol=1e-5, atol=1e-5), (gamma, out, ref)

    # Ragged / multi-tile path (batch not a multiple of the tile, >= 2 grid steps).
    b2, c2 = 37, 12
    logits2 = jax.random.normal(k4, (b2, c2), dtype=jnp.float32) * 2.0
    target2 = jax.random.randint(k5, (b2,), 0, c2, dtype=jnp.int32)
    out2 = focal_loss(logits2, target2, gamma=2.0)
    jax.block_until_ready(out2)
    ref2 = focal_loss_ref(logits2, target2, gamma=2.0)
    assert jnp.allclose(out2, ref2, rtol=1e-5, atol=1e-5), (out2, ref2)

    print("KERNEL_OK")
</pallas_src>

<mosaic_0001>
module attributes {stable_mosaic.version = 11 : i64} {
  func.func @_focal_loss_kernel(%arg0: i32, %arg1: memref<8x16xf32, #tpu.memory_space<vmem>>, %arg2: memref<8x1xi32, #tpu.memory_space<vmem>>, %arg3: memref<8x128xf32, #tpu.memory_space<vmem>>) attributes {dimension_semantics = [#tpu.dimension_semantics<parallel>], iteration_bounds = array<i64: 1>, scalar_prefetch = 0 : i64, scratch_operands = 0 : i64, tpu.core_type = #tpu.core_type<tc>, window_params = [{transform_indices = @transform_0, window_bounds = array<i64: 8, 16>}, {transform_indices = @transform_1, window_bounds = array<i64: 8, 1>}, {transform_indices = @transform_2, window_bounds = array<i64: 8, 128>}]} {
    %c0 = arith.constant 0 : index
    %c0_0 = arith.constant 0 : index
    %0 = vector.load %arg1[%c0, %c0_0] : memref<8x16xf32, #tpu.memory_space<vmem>>, vector<8x16xf32>
    %c0_1 = arith.constant 0 : index
    %c0_2 = arith.constant 0 : index
    %1 = vector.load %arg2[%c0_1, %c0_2] : memref<8x1xi32, #tpu.memory_space<vmem>>, vector<8x1xi32>
    %cst = arith.constant dense<0xFF800000> : vector<8xf32>
    %2 = vector.multi_reduction <maximumf>, %0, %cst [1] : vector<8x16xf32> to vector<8xf32>
    %3 = vector.shape_cast %2 : vector<8xf32> to vector<8x1xf32>
    %4 = vector.broadcast %3 : vector<8x1xf32> to vector<8x16xf32>
    %5 = arith.subf %0, %4 : vector<8x16xf32>
    %6 = math.exp %5 : vector<8x16xf32>
    %cst_3 = arith.constant dense<0.000000e+00> : vector<8xf32>
    %7 = vector.multi_reduction <add>, %6, %cst_3 [1] : vector<8x16xf32> to vector<8xf32>
    %8 = vector.shape_cast %7 : vector<8xf32> to vector<8x1xf32>
    %9 = math.log %8 : vector<8x1xf32>
    %10 = tpu.iota {dimensions = array<i32: 1>} : vector<8x16xi32>
    %11 = vector.broadcast %1 : vector<8x1xi32> to vector<8x16xi32>
    %12 = arith.cmpi eq, %11, %10 : vector<8x16xi32>
    %cst_4 = arith.constant 0.000000e+00 : f32
    %13 = vector.broadcast %cst_4 : f32 to vector<8x16xf32>
    %14 = arith.select %12, %5, %13 : vector<8x16xi1>, vector<8x16xf32>
    %cst_5 = arith.constant dense<0.000000e+00> : vector<8xf32>
    %15 = vector.multi_reduction <add>, %14, %cst_5 [1] : vector<8x16xf32> to vector<8xf32>
    %16 = vector.shape_cast %15 : vector<8xf32> to vector<8x1xf32>
    %17 = arith.subf %9, %16 : vector<8x1xf32>
    %18 = vector.shape_cast %17 : vector<8x1xf32> to vector<1x8x1xf32>
    %cst_6 = arith.constant dense<0.000000e+00> : vector<1xf32>
    %19 = vector.multi_reduction <add>, %18, %cst_6 [1, 2] : vector<1x8x1xf32> to vector<1xf32>
    %20 = vector.shape_cast %19 : vector<1xf32> to vector<1x1x1xf32>
    %21 = vector.extract %20[0, 0, 0] : f32 from vector<1x1x1xf32>
    %22 = tpu.iota {dimensions = array<i32: 0>} : vector<8x128xi32>
    %23 = tpu.iota {dimensions = array<i32: 1>} : vector<8x128xi32>
    %c0_i32 = arith.constant 0 : i32
    %24 = vector.broadcast %c0_i32 : i32 to vector<8x128xi32>
    %25 = arith.cmpi eq, %22, %24 : vector<8x128xi32>
    %c0_i32_7 = arith.constant 0 : i32
    %26 = vector.broadcast %c0_i32_7 : i32 to vector<8x128xi32>
    %27 = arith.cmpi eq, %23, %26 : vector<8x128xi32>
    %28 = arith.andi %25, %27 : vector<8x128xi1>
    %cst_8 = arith.constant 0.000000e+00 : f32
    %29 = vector.broadcast %21 : f32 to vector<8x128xf32>
    %30 = vector.broadcast %cst_8 : f32 to vector<8x128xf32>
    %31 = arith.select %28, %29, %30 : vector<8x128xi1>, vector<8x128xf32>
    %c0_9 = arith.constant 0 : index
    %c0_10 = arith.constant 0 : index
    %32 = vector.load %arg3[%c0_9, %c0_10] : memref<8x128xf32, #tpu.memory_space<vmem>>, vector<8x128xf32>
    tpu.vector_store %arg3[%c0_9, %c0_10], %31 {strides = array<i32>} : memref<8x128xf32, #tpu.memory_space<vmem>>, vector<8x128xf32>,
    return
  }
  func.func @transform_0(%arg0: i32) -> (i32, i32) {
    %c0_i32 = arith.constant 0 : i32
    %c0_i32_0 = arith.constant 0 : i32
    return %arg0, %c0_i32 : i32, i32
  }
  func.func @transform_1(%arg0: i32) -> (i32, i32) {
    %c0_i32 = arith.constant 0 : i32
    %c0_i32_0 = arith.constant 0 : i32
    return %arg0, %c0_i32 : i32, i32
  }
  func.func @transform_2(%arg0: i32) -> (i32, i32) {
    %c0_i32 = arith.constant 0 : i32
    %c0_i32_0 = arith.constant 0 : i32
    return %arg0, %c0_i32 : i32, i32
  }
}

</mosaic_0001>

<bundles_post_ra>
// kernel: tpu_custom_call.1
= control target key start
LH: loop header
LB: loop body
LE: loop exit
PB: predicated region body
PF: predicated region fallthrough
CT: control target
= control target key end

     0   :  { %vm14_vm0 = vcmask 130048   ;;  %s136_s0 = inlined_call_operand.vmem [shape: f32[8,16], index: 0, kind: input, shape index: {}]   ;;  %s137_s1 = inlined_call_operand.vmem [shape: s32[8,1], index: 1, kind: input, shape index: {}]   ;;  %s138_s2 = inlined_call_operand.hbm [shape: f32[8,128], index: 2, kind: output, shape index: {}]  }
   0x1   :  { %v12_v0 = vld [vmem:[%s136_s0] sm:$0xff] }
   0x2   :  { %7 = vsyncpa [#allocation3], 0  ;;  %v15_v1 = vsel %vm14_vm0, %v12_v0, -inf  ;;  %v107_v2 = vmov 0   ;;  %v13_v3 = vld [vmem:[%s137_s1] sm:$0xff]  ;;  %v26_v9 = vlaneseq  ;;  %vm37_vm2 = vcmask 7168  }
   0x3   :  { %76 = vset.pattern.permute.xlu0 %v107_v2  ;;  %s108_s0 = smov [#allocation2]   ;;  %s63_s15 = sshll.u32 %s138_s2, 4  ;;  %s64_s15 = int_to_ptr.hbm [resolvable:$true] %s63_s15 }
   0x4   :  { %16 = vmax.xlane.f32.xlu0 %v15_v1  ;;  %v27_v10 = vand.u32 127, %v26_v9  ;;  %v49_v27 = vshrl.u32 %v26_v9, 7  ;;  %s61_s1 = sshll.u32 %s108_s0, 4  ;;  %s62_s1 = int_to_ptr.vmem [resolvable:$true] %s61_s1 }
   0x6   :  { %vm50_vm3 = vcmp.eq.s32.totalorder %v49_v27, 0  ;;  %vm51_vm4 = vcmp.eq.s32.totalorder %v27_v10, 0 }
   0x7   :  { %vm52_vm5 = vmand %vm50_vm3, %vm51_vm4 }
  0x18   :  { %29 = vperm.xlu0 %76, %v13_v3  }
  0x77   :  { %v17_v4 = vpop.xlane.xlu0 %16 }
  0x78   :  { %v18_v5 = vsub.f32 %v12_v0, %v17_v4 }
  0x7a   :  { %v19_v6 = vmul.f32 1.442695, %v18_v5 }
  0x7c   :  { %77 = vpow2.f32 %v19_v6 }
  0x82   :  { %v78_v7 = vpop.eup %77 }
  0x83   :  { %v21_v8 = vsel %vm14_vm0, %v78_v7, 0.0 }
  0x84   :  { %22 = vadd.xlane.f32.xlu1 %v21_v8 }
  0x8a   :  { %v30_v11 = vpop.permute.xlu0 %29 }
  0x8b   :  { %vm31_vm1 = vcmp.eq.s32.totalorder %v30_v11, %v27_v10 }
  0x8c   :  { %v32_v12 = vsel %vm31_vm1, %v18_v5, 0.0 }
  0x8d   :  { %v33_v13 = vsel %vm14_vm0, %v32_v12, 0.0 }
  0x8e   :  { %34 = vadd.xlane.f32.xlu1 %v33_v13 }
  0xf7   :  { %v23_v14 = vpop.xlane.xlu1 %22 }
  0xf8   :  { %79 = vlog2.f32 %v23_v14 }
  0xfe   :  { %v80_v15 = vpop.eup %79 }
  0xff   :  { %v25_v16 = vmul.f32 0.6931472, %v80_v15 }
 0x101   :  { %v35_v17 = vpop.xlane.xlu1 %34 }
 0x102   :  { %v36_v18 = vsub.f32 %v25_v16, %v35_v17 }
 0x104   :  { %v38_v19 = vsel %vm37_vm2, %v36_v18, 0.0 }
 0x105   :  { %39 = vadd.xlane.f32.xlu2 %v38_v19 }
 0x178   :  { %v40_v20 = vpop.xlane.xlu2 %39 }
 0x179   :  { %v41_v21 = vrot.slane %v40_v20, 4 }
 0x17b   :  { %v42_v22 = vadd.f32 %v41_v21, %v40_v20 }
 0x17d   :  { %v43_v23 = vrot.slane %v42_v22, 2 }
 0x17f   :  { %v44_v24 = vadd.f32 %v43_v23, %v42_v22 }
 0x181   :  { %v45_v25 = vrot.slane %v44_v24, 1 }
 0x183   :  { %v46_v26 = vadd.f32 %v45_v25, %v44_v24 }
 0x185   :  { %72 = vpush %v46_v26 }
 0x1b6   :  { %s73_s16 = spop %72 }
 0x1b7   :  { %v53_v28 = vstv %s73_s16 }
 0x1b8   :  { %v54_v29 = vsel %vm52_vm5, %v53_v28, 0.0 }
 0x1b9   :  { %55 = vst [vmem:[#allocation2] sm:$0xff] %v54_v29 }
 0x1ba   :  { %66 = dma.vmem_to_hbm [thread:$0]  %s62_s1, 128, %s64_s15, [#allocation3]  }
 0x1bb   :  { %105 = dma.done.wait [#allocation3], 128  }
 0x1bc   :  { %106 = vsyncadd [#allocation3], 4294967168 }
 0x1bd   :  { %71 = vsyncpa [#allocation3], 1 }

</bundles_post_ra>
